<compile_context>
chip_gen: v7x
topology: tpu7x:2x2x1
jax: 0.10.0
libtpu: 0.0.40
codegen_flags: <defaults>
</compile_context>

<pallas_src>
import math
import functools

import jax
import jax.numpy as jnp
from jax.experimental import pallas as pl
from jax.experimental.pallas import tpu as pltpu

_VMEM_LIMIT = 32 * 1024 * 1024  # safe on v7x (64 MiB physical) and v5e/v6e (128 MiB)


# ------------------------------- tiling helper -------------------------------------

def _pick_tile(dim, target, aligns=(128,)):
    """Largest t <= target with dim % t == 0 and t % align == 0, trying the given
    alignments in order.  Falls back to the full dim (always a legal block)."""
    if dim <= target:
        return dim
    for align in aligns:
        t = (target // align) * align
        while t >= align:
            if dim % t == 0:
                return t
            t -= align
    return dim


# ----------------------------- linear (matmul) kernel -------------------------------

def _matmul_kernel(x_ref, w_ref, o_ref, acc_ref):
    @pl.when(pl.program_id(2) == 0)
    def _():
        acc_ref[...] = jnp.zeros_like(acc_ref)

    acc_ref[...] += jnp.dot(x_ref[...], w_ref[...],
                            preferred_element_type=jnp.float32)

    @pl.when(pl.program_id(2) == pl.num_programs(2) - 1)
    def _():
        o_ref[...] = acc_ref[...].astype(o_ref.dtype)


def pallas_linear(x, w, *, tm=256, tn=256, tk=512):
    """x: (M, K) @ w: (K, N) -> (M, N), tiled with an f32 VMEM accumulator.
    TODO(synk): cast x/w to bf16 in production (accumulation stays f32)."""
    M, K = x.shape
    K2, N = w.shape
    assert K == K2
    tm = _pick_tile(M, tm, (8,))          # sublane dim of x / out
    tn = _pick_tile(N, tn, (256, 128))    # lane dim of w / out; 256 for dual MXU
    tk = _pick_tile(K, tk, (128,))        # lane dim of x, sublane dim of w
    grid = (M // tm, N // tn, K // tk)

    itemsize = x.dtype.itemsize
    # rough working-set guard (double-buffered blocks + f32 accumulator)
    est = 2 * (tm * tk + tk * tn + tm * tn) * itemsize + tm * tn * 4
    assert est <= _VMEM_LIMIT, f"matmul tile working set {est} B exceeds VMEM budget"

    cost = pl.CostEstimate(
        flops=2 * M * N * K,
        transcendentals=0,
        bytes_accessed=(M * K + K * N + M * N) * itemsize,
    )

    return pl.pallas_call(
        _matmul_kernel,
        out_shape=jax.ShapeDtypeStruct((M, N), x.dtype),
        grid_spec=pltpu.PrefetchScalarGridSpec(
            num_scalar_prefetch=0,
            grid=grid,
            in_specs=[
                pl.BlockSpec((tm, tk), lambda i, j, k: (i, k)),
                pl.BlockSpec((tk, tn), lambda i, j, k: (k, j)),
            ],
            out_specs=pl.BlockSpec((tm, tn), lambda i, j, k: (i, j)),
            scratch_shapes=[pltpu.VMEM((tm, tn), jnp.float32)],
        ),
        compiler_params=pltpu.CompilerParams(
            dimension_semantics=("parallel", "parallel", "arbitrary"),
            vmem_limit_bytes=_VMEM_LIMIT,
        ),
        cost_estimate=cost,
    )(x, w)


# ------------------------------- rotary embedding -----------------------------------

def precompute_cos_sin_full(head_dim, positions, theta=10000.0):
    """Full-width (S, D) cos and sign-baked sin so the in-kernel rope is
    x * cos_full + rotate_half(x) * sin_signed   (lane-dense loads)."""
    half = head_dim // 2
    j = jnp.arange(0, head_dim, 2, dtype=jnp.float32)[:half]
    freqs = 1.0 / (theta ** (j / head_dim))
    angles = jnp.outer(positions.astype(jnp.float32), freqs)   # (S, D//2)
    cos = jnp.cos(angles)
    sin = jnp.sin(angles)
    cos_full = jnp.concatenate([cos, cos], axis=-1)            # (S, D)
    sin_signed = jnp.concatenate([-sin, sin], axis=-1)         # (S, D)
    return cos_full, sin_signed


def _rotate_half(x, use_roll):
    """concat([x[..., D/2:], x[..., :D/2]]).  pltpu.roll (XLU slot) when the lane
    dim is a 128 multiple, concat fallback for tiny test head_dim."""
    half = x.shape[-1] // 2
    if use_roll:
        return pltpu.roll(x, shift=half, axis=-1)
    return jnp.concatenate([x[..., half:], x[..., :half]], axis=-1)


# ------------------------ flash-style rope + attention kernel -----------------------

def _flash_attn_kernel(q_ref, k_ref, v_ref, cosq_ref, sinq_ref, cosk_ref, sink_ref,
                       o_ref,
                       qr_ref, m_ref, l_ref, acc_ref,
                       *, scale, causal, q_tile, kv_tile, n_groups, use_roll):
    qi = pl.program_id(2)
    ki = pl.program_id(3)

    @pl.when(ki == 0)
    def _init():
        # RoPE + 1/sqrt(D) fold on all q heads of the GQA group (once per
        # (b, kvh, q-block); cached in VMEM scratch across KV blocks).
        cos = cosq_ref[...]
        sin = sinq_ref[...]
        for g in range(n_groups):
            q = q_ref[0, g].astype(jnp.float32)                     # (Tq, D)
            qr = q * cos + _rotate_half(q, use_roll) * sin
            qr_ref[g] = (qr * scale).astype(qr_ref.dtype)
        m_ref[...] = jnp.full_like(m_ref, -jnp.inf)
        l_ref[...] = jnp.zeros_like(l_ref)
        acc_ref[...] = jnp.zeros_like(acc_ref)

    def step():
        # K RoPE recomputed per KV block (hidden under the MXU slot) instead of a
        # separate prepass that would round-trip K through HBM.
        k = k_ref[0, 0].astype(jnp.float32)                         # (Tkv, D)
        kr = (k * cosk_ref[...] + _rotate_half(k, use_roll) * sink_ref[...]
              ).astype(qr_ref.dtype)
        v = v_ref[0, 0]                                             # (Tkv, D)

        if causal:
            q_pos = qi * q_tile + jax.lax.broadcasted_iota(
                jnp.int32, (q_tile, kv_tile), 0)
            kv_pos = ki * kv_tile + jax.lax.broadcasted_iota(
                jnp.int32, (q_tile, kv_tile), 1)
            keep = kv_pos <= q_pos

        for g in range(n_groups):
            qg = qr_ref[g]                                          # (Tq, D)
            # scores = qg @ kr^T without materializing a transpose of kr.
            s = jax.lax.dot_general(qg, kr,
                                    dimension_numbers=(((1,), (1,)), ((), ())),
                                    preferred_element_type=jnp.float32)  # (Tq,Tkv)
            if causal:
                s = jnp.where(keep, s, -1e30)   # keep the mask in f32

            m_prev = m_ref[g]
            m_new = jnp.maximum(m_prev, jnp.max(s, axis=-1, keepdims=True))
            alpha = jnp.exp(m_prev - m_new)
            p = jnp.exp(s - m_new)
            l_ref[g] = alpha * l_ref[g] + jnp.sum(p, axis=-1, keepdims=True)
            acc_ref[g] = alpha * acc_ref[g] + jnp.dot(
                p.astype(v.dtype), v, preferred_element_type=jnp.float32)
            m_ref[g] = m_new

    if causal:
        # Skip fully-masked KV blocks (~halves MXU/EUP work); the clamped K/V
        # index_map keeps the already-resident block so no DMA is issued either.
        pl.when(ki * kv_tile <= qi * q_tile + (q_tile - 1))(step)
    else:
        step()

    @pl.when(ki == pl.num_programs(3) - 1)
    def _finalize():
        for g in range(n_groups):
            # TODO(synk): approx=True routes the divide to the EUP in production.
            inv_l = pl.reciprocal(l_ref[g], approx=False)
            o_ref[0, g] = (acc_ref[g] * inv_l).astype(o_ref.dtype)


def pallas_flash_rope_attention(xq, xk, xv, cos_full, sin_signed, n_kv_groups,
                                *, causal=False, q_tile=256, kv_tile=512):
    """
    xq: (B, H, S, D) un-roped queries; xk/xv: (B, Hkv, S, D) un-roped keys / values;
    cos_full/sin_signed: (S, D).  Returns (B, H, S, D).
    All q heads of one GQA group share a grid step so K/V is DMA'd once per kv head.
    On v5e/v6e (128 MiB VMEM) larger q_tile/kv_tile (512/1024) are worthwhile.
    """
    B, H, S, D = xq.shape
    Hkv = xk.shape[1]
    G = n_kv_groups
    assert H == Hkv * G
    scale = 1.0 / math.sqrt(D)
    Tq = _pick_tile(S, q_tile, (8,))
    Tkv = _pick_tile(S, kv_tile, (8,))
    grid = (B, Hkv, S // Tq, S // Tkv)
    use_roll = (D % 128 == 0)

    itemsize = xq.dtype.itemsize
    # rough working-set guard (double-buffered blocks + scratch); catches the
    # _pick_tile full-dim fallback before it silently blows past VMEM.
    est = (2 * (G * Tq * D) * itemsize          # Q block
           + 2 * 2 * (Tkv * D) * itemsize       # K + V blocks
           + 2 * (G * Tq * D) * itemsize        # output block
           + 2 * 2 * (Tq + Tkv) * D * 4         # cos/sin blocks
           + G * Tq * D * itemsize              # qr scratch
           + G * Tq * (D + 2) * 4)              # acc + m + l scratch
    assert est <= _VMEM_LIMIT, f"attention tile working set {est} B exceeds VMEM budget"

    kernel = functools.partial(_flash_attn_kernel, scale=scale, causal=causal,
                               q_tile=Tq, kv_tile=Tkv, n_groups=G, use_roll=use_roll)

    if causal:
        def kv_block(qi, ki):
            last_needed = (qi * Tq + Tq - 1) // Tkv
            return jnp.minimum(ki, last_needed)
    else:
        def kv_block(qi, ki):
            return ki

    q_map = lambda b, kvh, qi, ki: (b, kvh, qi, 0)
    kv_map = lambda b, kvh, qi, ki: (b, kvh, kv_block(qi, ki), 0)
    cosq_map = lambda b, kvh, qi, ki: (qi, 0)
    cosk_map = lambda b, kvh, qi, ki: (kv_block(qi, ki), 0)

    flops = 4 * B * H * S * S * D
    transcendentals = B * H * S * S
    if causal:
        flops //= 2
        transcendentals //= 2
    bytes_accessed = (2 * xq.size + xk.size + xv.size) * itemsize + 2 * S * D * 4
    cost = pl.CostEstimate(flops=int(flops), transcendentals=int(transcendentals),
                           bytes_accessed=int(bytes_accessed))

    return pl.pallas_call(
        kernel,
        out_shape=jax.ShapeDtypeStruct((B, H, S, D), xq.dtype),
        grid_spec=pltpu.PrefetchScalarGridSpec(
            num_scalar_prefetch=0,
            grid=grid,
            in_specs=[
                pl.BlockSpec((1, G, Tq, D), q_map),     # all q heads of the group
                pl.BlockSpec((1, 1, Tkv, D), kv_map),   # K (GQA: indexed by kv head)
                pl.BlockSpec((1, 1, Tkv, D), kv_map),   # V
                pl.BlockSpec((Tq, D), cosq_map),        # cos for Q rows
                pl.BlockSpec((Tq, D), cosq_map),        # sign-baked sin for Q rows
                pl.BlockSpec((Tkv, D), cosk_map),       # cos for K rows
                pl.BlockSpec((Tkv, D), cosk_map),       # sign-baked sin for K rows
            ],
            out_specs=pl.BlockSpec((1, G, Tq, D), q_map),
            scratch_shapes=[
                pltpu.VMEM((G, Tq, D), xq.dtype),       # roped + pre-scaled Q
                pltpu.VMEM((G, Tq, 1), jnp.float32),    # m (running max)
                pltpu.VMEM((G, Tq, 1), jnp.float32),    # l (running denom)
                pltpu.VMEM((G, Tq, D), jnp.float32),    # acc
            ],
        ),
        compiler_params=pltpu.CompilerParams(
            dimension_semantics=("parallel", "parallel", "parallel", "arbitrary"),
            vmem_limit_bytes=_VMEM_LIMIT,
        ),
        cost_estimate=cost,
    )(xq, xk, xv, cos_full, sin_signed, cos_full, sin_signed)


# --------------------------------- module wrapper ------------------------------------

def quant_attention_fused_forward(hidden_states, qkv_w, o_w, *, n_heads, n_kv_heads,
                                  start_pos=0, causal=False):
    """Pallas implementation of QuantAttentionFused.forward (prefill path).
    causal=False matches attention_mask=None (the module applies no mask itself)."""
    bsz, seqlen, hidden_size = hidden_states.shape
    head_dim = hidden_size // n_heads
    n_kv_groups = n_heads // n_kv_heads

    # 1. QKV projection (tiled Pallas matmul)
    x2d = hidden_states.reshape(bsz * seqlen, hidden_size)
    xqkv = pallas_linear(x2d, qkv_w)                               # (B*S, (H+2*Hkv)*D)
    xqkv = xqkv.reshape(bsz, seqlen, n_heads + 2 * n_kv_heads, head_dim)

    xq = xqkv[:, :, 0:n_heads]                                     # (B, S, H,   D)
    xk = xqkv[:, :, n_heads:n_heads + n_kv_heads]                  # (B, S, Hkv, D)
    xv = xqkv[:, :, n_heads + n_kv_heads:]                         # (B, S, Hkv, D)

    # TODO(synk): for head_dim % 128 == 0 fold these transposes/slices into the
    #             attention BlockSpec index_maps; kept as XLA layout glue here.
    xq = jnp.transpose(xq, (0, 2, 1, 3))
    xk = jnp.transpose(xk, (0, 2, 1, 3))
    xv = jnp.transpose(xv, (0, 2, 1, 3))

    positions = jnp.arange(start_pos, start_pos + seqlen)
    cos_full, sin_signed = precompute_cos_sin_full(head_dim, positions)

    # 2. Fused RoPE (Q and K) + flash attention, GQA-grouped.
    out = pallas_flash_rope_attention(xq, xk, xv, cos_full, sin_signed, n_kv_groups,
                                      causal=causal)               # (B, H, S, D)

    attention_weight = jnp.transpose(out, (0, 2, 1, 3)).reshape(bsz, seqlen, -1)

    # 3. Output projection (tiled Pallas matmul)
    attn_output = pallas_linear(
        attention_weight.reshape(bsz * seqlen, hidden_size), o_w
    ).reshape(bsz, seqlen, hidden_size)

    return attn_output, attention_weight


# --------------------------------- pure-JAX reference --------------------------------

def reference_forward(hidden_states, qkv_w, o_w, *, n_heads, n_kv_heads,
                      start_pos=0, causal=False):
    bsz, seqlen, hidden_size = hidden_states.shape
    head_dim = hidden_size // n_heads
    n_kv_groups = n_heads // n_kv_heads

    xqkv = hidden_states.reshape(bsz * seqlen, hidden_size) @ qkv_w
    xqkv = xqkv.reshape(bsz, seqlen, n_heads + 2 * n_kv_heads, head_dim)
    xq = xqkv[:, :, 0:n_heads]
    xk = xqkv[:, :, n_heads:n_heads + n_kv_heads]
    xv = xqkv[:, :, n_heads + n_kv_heads:]

    positions = jnp.arange(start_pos, start_pos + seqlen)
    half = head_dim // 2
    j = jnp.arange(0, head_dim, 2, dtype=jnp.float32)[:half]
    freqs = 1.0 / (10000.0 ** (j / head_dim))
    angles = jnp.outer(positions.astype(jnp.float32), freqs)
    cos = jnp.cos(angles)[None, :, None, :]
    sin = jnp.sin(angles)[None, :, None, :]

    def rope(x):
        x1, x2 = x[..., :half], x[..., half:]
        return jnp.concatenate([x1 * cos - x2 * sin, x1 * sin + x2 * cos], axis=-1)

    xq = rope(xq.astype(jnp.float32))
    xk = rope(xk.astype(jnp.float32))

    keys = jnp.repeat(xk, n_kv_groups, axis=2)
    values = jnp.repeat(xv, n_kv_groups, axis=2)

    xq_t = jnp.transpose(xq, (0, 2, 1, 3))
    k_t = jnp.transpose(keys, (0, 2, 1, 3))
    v_t = jnp.transpose(values, (0, 2, 1, 3)).astype(jnp.float32)

    scores = jnp.einsum("bhqd,bhkd->bhqk", xq_t, k_t) / math.sqrt(head_dim)
    if causal:
        q_pos = jnp.arange(seqlen)[:, None]
        kv_pos = jnp.arange(seqlen)[None, :]
        mask = jnp.where(kv_pos <= q_pos, 0.0, -jnp.inf)
        scores = scores + mask[None, None]
    scores = jax.nn.softmax(scores.astype(jnp.float32), axis=-1)
    out = jnp.einsum("bhqk,bhkd->bhqd", scores, v_t)
    attention_weight = jnp.transpose(out, (0, 2, 1, 3)).reshape(bsz, seqlen, -1)
    attn_output = (attention_weight.reshape(bsz * seqlen, hidden_size) @ o_w
                   ).reshape(bsz, seqlen, hidden_size)
    return attn_output, attention_weight


# -------------------------------------- main -----------------------------------------

if __name__ == "__main__":
    # small config consistent with the module
    bsz = 2          # conceptually AWQ_BATCH_SIZE=2 (cache_batch_size)
    seqlen = 8
    n_heads = 4
    n_kv_heads = 2   # GQA, n_kv_groups = 2
    head_dim = 16
    hidden_size = n_heads * head_dim                 # 64
    qkv_out = (n_heads + 2 * n_kv_heads) * head_dim  # 128

    key = jax.random.PRNGKey(0)
    k1, k2, k3 = jax.random.split(key, 3)
    hidden_states = jax.random.normal(k1, (bsz, seqlen, hidden_size), dtype=jnp.float32)
    # deterministic synthetic weights (the real module holds quantized WQLinear layers)
    qkv_w = jax.random.normal(k2, (hidden_size, qkv_out), dtype=jnp.float32) * 0.05
    o_w = jax.random.normal(k3, (hidden_size, hidden_size), dtype=jnp.float32) * 0.05

    # --- prefill with attention_mask=None (the module's default path) ---
    attn_output, attention_weight = quant_attention_fused_forward(
        hidden_states, qkv_w, o_w, n_heads=n_heads, n_kv_heads=n_kv_heads, causal=False
    )
    attn_output = jax.block_until_ready(attn_output)
    attention_weight = jax.block_until_ready(attention_weight)

    ref_out, ref_aw = reference_forward(
        hidden_states, qkv_w, o_w, n_heads=n_heads, n_kv_heads=n_kv_heads, causal=False
    )
    assert attn_output.shape == (bsz, seqlen, hidden_size)
    assert attention_weight.shape == (bsz, seqlen, hidden_size)
    assert jnp.allclose(attn_output, ref_out, atol=1e-4, rtol=1e-4)
    assert jnp.allclose(attention_weight, ref_aw, atol=1e-4, rtol=1e-4)

    # --- causal-masked prefill (what an upstream decoder layer would request) ---
    attn_output_c, attention_weight_c = quant_attention_fused_forward(
        hidden_states, qkv_w, o_w, n_heads=n_heads, n_kv_heads=n_kv_heads, causal=True
    )
    attn_output_c = jax.block_until_ready(attn_output_c)
    ref_out_c, ref_aw_c = reference_forward(
        hidden_states, qkv_w, o_w, n_heads=n_heads, n_kv_heads=n_kv_heads, causal=True
    )
    assert jnp.allclose(attn_output_c, ref_out_c, atol=1e-4, rtol=1e-4)
    assert jnp.allclose(attention_weight_c, ref_aw_c, atol=1e-4, rtol=1e-4)

    print("KERNEL_OK")
</pallas_src>

<mosaic_0001>
module attributes {stable_mosaic.version = 11 : i64} {
  func.func @_matmul_kernel(%arg0: i32, %arg1: i32, %arg2: i32, %arg3: memref<16x64xf32, #tpu.memory_space<vmem>>, %arg4: memref<64x128xf32, #tpu.memory_space<vmem>>, %arg5: memref<16x128xf32, #tpu.memory_space<vmem>>, %arg6: memref<16x128xf32, #tpu.memory_space<vmem>>) attributes {dimension_semantics = [#tpu.dimension_semantics<parallel>, #tpu.dimension_semantics<parallel>, #tpu.dimension_semantics<arbitrary>], iteration_bounds = array<i64: 1, 1, 1>, scalar_prefetch = 0 : i64, scratch_operands = 1 : i64, tpu.core_type = #tpu.core_type<tc>, window_params = [{transform_indices = @transform_0, window_bounds = array<i64: 16, 64>}, {transform_indices = @transform_1, window_bounds = array<i64: 64, 128>}, {transform_indices = @transform_2, window_bounds = array<i64: 16, 128>}]} {
    %c0_i32 = arith.constant 0 : i32
    %0 = arith.cmpi eq, %arg2, %c0_i32 : i32
    %1 = arith.extui %0 : i1 to i32
    %c0_i32_0 = arith.constant 0 : i32
    %2 = arith.cmpi ne, %1, %c0_i32_0 : i32
    scf.if %2 {
      %cst_10 = arith.constant 0.000000e+00 : f32
      %12 = vector.broadcast %cst_10 : f32 to vector<16x128xf32>
      %c0_11 = arith.constant 0 : index
      %c0_12 = arith.constant 0 : index
      %13 = vector.load %arg6[%c0_11, %c0_12] : memref<16x128xf32, #tpu.memory_space<vmem>>, vector<16x128xf32>
      tpu.vector_store %arg6[%c0_11, %c0_12], %12 {strides = array<i32>} : memref<16x128xf32, #tpu.memory_space<vmem>>, vector<16x128xf32>,
    } else {
    }
    %c0 = arith.constant 0 : index
    %c0_1 = arith.constant 0 : index
    %3 = vector.load %arg6[%c0, %c0_1] : memref<16x128xf32, #tpu.memory_space<vmem>>, vector<16x128xf32>
    %c0_2 = arith.constant 0 : index
    %c0_3 = arith.constant 0 : index
    %4 = vector.load %arg3[%c0_2, %c0_3] : memref<16x64xf32, #tpu.memory_space<vmem>>, vector<16x64xf32>
    %c0_4 = arith.constant 0 : index
    %c0_5 = arith.constant 0 : index
    %5 = vector.load %arg4[%c0_4, %c0_5] : memref<64x128xf32, #tpu.memory_space<vmem>>, vector<64x128xf32>
    %cst = arith.constant dense<0.000000e+00> : vector<16x128xf32>
    %6 = tpu.matmul %4, %5, %cst {dimension_numbers = #tpu.dot_dimension_numbers<[1], [0], [0], [1], [0, 0, 1, 1], [], []>} : vector<16x64xf32>, vector<64x128xf32>, vector<16x128xf32> -> vector<16x128xf32>
    %7 = arith.addf %3, %6 : vector<16x128xf32>
    %c0_6 = arith.constant 0 : index
    %c0_7 = arith.constant 0 : index
    %8 = vector.load %arg6[%c0_6, %c0_7] : memref<16x128xf32, #tpu.memory_space<vmem>>, vector<16x128xf32>
    tpu.vector_store %arg6[%c0_6, %c0_7], %7 {strides = array<i32>} : memref<16x128xf32, #tpu.memory_space<vmem>>, vector<16x128xf32>,
    %c0_i32_8 = arith.constant 0 : i32
    %9 = arith.cmpi eq, %arg2, %c0_i32_8 : i32
    %10 = arith.extui %9 : i1 to i32
    %c0_i32_9 = arith.constant 0 : i32
    %11 = arith.cmpi ne, %10, %c0_i32_9 : i32
    scf.if %11 {
      %c0_10 = arith.constant 0 : index
      %c0_11 = arith.constant 0 : index
      %12 = vector.load %arg6[%c0_10, %c0_11] : memref<16x128xf32, #tpu.memory_space<vmem>>, vector<16x128xf32>
      %c0_12 = arith.constant 0 : index
      %c0_13 = arith.constant 0 : index
      %13 = vector.load %arg5[%c0_12, %c0_13] : memref<16x128xf32, #tpu.memory_space<vmem>>, vector<16x128xf32>
      tpu.vector_store %arg5[%c0_12, %c0_13], %12 {strides = array<i32>} : memref<16x128xf32, #tpu.memory_space<vmem>>, vector<16x128xf32>,
    } else {
    }
    return
  }
  func.func @transform_0(%arg0: i32, %arg1: i32, %arg2: i32) -> (i32, i32) {
    %c0_i32 = arith.constant 0 : i32
    return %arg0, %arg2 : i32, i32
  }
  func.func @transform_1(%arg0: i32, %arg1: i32, %arg2: i32) -> (i32, i32) {
    %c0_i32 = arith.constant 0 : i32
    return %arg2, %arg1 : i32, i32
  }
  func.func @transform_2(%arg0: i32, %arg1: i32, %arg2: i32) -> (i32, i32) {
    %c0_i32 = arith.constant 0 : i32
    return %arg0, %arg1 : i32, i32
  }
}

</mosaic_0001>

<bundles_post_ra>
// kernel: tpu_custom_call.1
= control target key start
LH: loop header
LB: loop body
LE: loop exit
PB: predicated region body
PF: predicated region fallthrough
CT: control target
= control target key end

     0   :  { %7 = vsyncpa [#allocation4], 0  ;;  %s360_s0 = inlined_call_operand.hbm [shape: f32[16,64], index: 0, kind: input, shape index: {}]   ;;  %s361_s1 = inlined_call_operand.hbm [shape: f32[64,128], index: 1, kind: input, shape index: {}]   ;;  %s362_s2 = inlined_call_operand.hbm [shape: f32[16,128], index: 2, kind: output, shape index: {}]  }
   0x1   :  { %8 = vsyncpa [#allocation7], 0 }
   0x2   :  { %9 = vsyncpa [#allocation5], 0  ;;  %s293_s9 = smov [#allocation3]   ;;  %s221_s13 = scalar_lea.hbm %s360_s0, 256 }
   0x3   :  { %s15_s10 = sshll.u32 %s293_s9, 4  ;;  %p222_p0 = scmp.ne.s32.totalorder %s360_s0, %s221_s13  ;;  %s16_s10 = int_to_ptr.vmem [resolvable:$true] %s15_s10 }
   0x4   :  { %p225_p1 = scmp.lt.u32.totalorder %s221_s13, %s360_s0 }
   0x6   :  { %p227_p2 = pnand %p225_p1, %p222_p0 }
   0x8   :  { %230 = shalt.err (!%p227_p2)
}
   0x9   :  { %s231_s18 = scalar_lea.vmem %s16_s10, 256  ;;  %p236_p4 = scmp.lt.s32.totalorder %s16_s10, %s16_s10 }
   0xa   :  { %p232_p3 = scmp.ne.s32.totalorder %s16_s10, %s231_s18  ;;  %p237_p5 = scmp.lt.s32.totalorder %s231_s18, %s231_s18 }
   0xc   :  { %p238_p6 = por %p237_p5, %p236_p4 }
   0xe   :  { %p239_p7 = pnand %p238_p6, %p232_p3 }
  0x10   :  { %242 = shalt.err (!%p239_p7)
}
  0x11   :  { %s294_s19 = smov 128   ;;  %s295_s20 = smov 8  }
  0x12   :  { %21 = dma.hbm_to_vmem [thread:$0]  %s360_s0, 256, %s16_s10, [#allocation4], %s294_s19, %s294_s19, %s295_s20  }
  0x13   :  { %s296_s23 = smov [#allocation6]   ;;  %s243_s27 = scalar_lea.hbm %s361_s1, 1024 }
  0x14   :  { %s27_s24 = sshll.u32 %s296_s23, 4  ;;  %p244_p8 = scmp.ne.s32.totalorder %s361_s1, %s243_s27  ;;  %s28_s24 = int_to_ptr.vmem [resolvable:$true] %s27_s24 }
  0x15   :  { %p247_p9 = scmp.lt.u32.totalorder %s243_s27, %s361_s1 }
  0x17   :  { %p249_p10 = pnand %p247_p9, %p244_p8 }
  0x19   :  { %252 = shalt.err (!%p249_p10)
}
  0x1a   :  { %s253_s4 = scalar_lea.vmem %s28_s24, 1024  ;;  %p258_p12 = scmp.lt.s32.totalorder %s28_s24, %s28_s24 }
  0x1b   :  { %p254_p11 = scmp.ne.s32.totalorder %s28_s24, %s253_s4  ;;  %p259_p13 = scmp.lt.s32.totalorder %s253_s4, %s253_s4 }
  0x1d   :  { %p260_p0 = por %p259_p13, %p258_p12 }
  0x1f   :  { %p261_p1 = pnand %p260_p0, %p254_p11 }
  0x21   :  { %264 = shalt.err (!%p261_p1)
}
  0x22   :  { %33 = dma.hbm_to_vmem [thread:$0]  %s361_s1, 1024, %s28_s24, [#allocation7], %s294_s19, %s294_s19, %s295_s20  }
  0x23   :  { %287 = dma.done.wait [#allocation4], 256  }
  0x24   :  { %288 = vsyncadd [#allocation4], 4294967040 }
  0x25   :  { %289 = dma.done.wait [#allocation7], 1024  }
  0x26   :  { %290 = vsyncadd [#allocation7], 4294966272  ;;  %v50_v0 = vld [vmem:[#allocation6] sm:$0xff]  ;;  %v51_v1 = vld [vmem:[#allocation6 + $0x8] sm:$0xff]  ;;  %vm58_vm0 = vcmask 523264   ;;  %s297_s1 = smov [#allocation8]  }
  0x27   :  { %v52_v2 = vld [vmem:[#allocation6 + $0x10] sm:$0xff]  ;;  %v200_v3 = vpack.c.bf16 %v51_v1, %v50_v0  ;;  %v53_v4 = vld [vmem:[#allocation6 + $0x18] sm:$0xff]  ;;  %v54_v6 = vld [vmem:[#allocation6 + $0x20] sm:$0xff]  ;;  %s156_s6 = sshll.u32 %s297_s1, 4  ;;  %s157_s6 = int_to_ptr.vmem [resolvable:$true] %s156_s6 }
  0x28   :  { %v204_v5 = vpack.c.bf16 %v53_v4, %v52_v2  ;;  %v55_v7 = vld [vmem:[#allocation6 + $0x28] sm:$0xff]  ;;  %v48_v8 = vld [vmem:[#allocation3] sm:$0xff]  ;;  %v57_v11 = vld [vmem:[#allocation6 + $0x38] sm:$0xff]  ;;  %s265_s7 = scalar_lea.vmem %s157_s6, 256  ;;  %p270_p3 = scmp.lt.s32.totalorder %s157_s6, %s157_s6 }
  0x29   :  { %201 = vmatprep.subr.bf16.mxu0 %v200_v3  ;;  %197 = vmatprep.mubr.msk.f32.mxu0 %vm58_vm0, %v48_v8  ;;  %v208_v9 = vpack.c.bf16 %v55_v7, %v54_v6  ;;  %v56_v10 = vld [vmem:[#allocation6 + $0x30] sm:$0xff]  ;;  %v49_v13 = vld [vmem:[#allocation3 + $0x8] sm:$0xff]  ;;  %p266_p2 = scmp.ne.s32.totalorder %s157_s6, %s265_s7  ;;  %p271_p4 = scmp.lt.s32.totalorder %s265_s7, %s265_s7 }
  0x2a   :  { %203 = vmatpush3.bf16.msra.mxu0 %v200_v3  ;;  %v212_v12 = vpack.c.bf16 %v57_v11, %v56_v10 }
  0x2b   :  { %205 = vmatprep.subr.bf16.mxu0 %v204_v5  ;;  %p272_p5 = por %p271_p4, %p270_p3 }
  0x2d   :  { %p273_p6 = pnand %p272_p5, %p266_p2 }
  0x2e   :  { %207 = vmatpush3.bf16.msra.mxu0 %v204_v5 }
  0x2f   :  { %209 = vmatprep.subr.bf16.mxu0 %v208_v9 }
  0x32   :  { %211 = vmatpush3.bf16.msra.mxu0 %v208_v9 }
  0x33   :  { %213 = vmatprep.subr.bf16.mxu0 %v212_v12 }
  0x36   :  { %215 = vmatpush3.bf16.msra.mxu0 %v212_v12 }
  0x39   :  { %198 = vmatmul.mubr.msk.f32.vlgmr.msra.gmra.mrb[0].mxu0 %vm58_vm0, %v49_v13 }
 0x10c   :  { %v199_v14 = vpop.f32.mrb[0].mxu0 }
 0x10d   :  { %150 = vst [vmem:[#allocation8 + $0x8] sm:$0xff] %v199_v14  ;;  %v131_v15 = vpop.f32.mrb[1].mxu0 }
 0x10e   :  { %149 = vst [vmem:[#allocation8] sm:$0xff] %v131_v15 }
 0x10f   :  { %276 = shalt.err (!%p273_p6)
}
 0x110   :  { %s277_s10 = scalar_lea.hbm %s362_s2, 256 }
 0x111   :  { %p278_p7 = scmp.ne.s32.totalorder %s362_s2, %s277_s10  ;;  %p281_p8 = scmp.lt.u32.totalorder %s277_s10, %s362_s2 }
 0x113   :  { %p283_p9 = pnand %p281_p8, %p278_p7 }
 0x115   :  { %286 = shalt.err (!%p283_p9)
}
 0x116   :  { %162 = dma.vmem_to_hbm [thread:$0]  %s157_s6, 256, %s362_s2, [#allocation5], %s294_s19, %s294_s19, %s295_s20  }
 0x117   :  { %291 = dma.done.wait [#allocation5], 256  }
 0x118   :  { %292 = vsyncadd [#allocation5], 4294967040 }
 0x119   :  { %166 = vsyncpa [#allocation4], 1 }
 0x11a   :  { %167 = vsyncpa [#allocation7], 1 }
 0x11b   :  { %168 = vsyncpa [#allocation5], 1 }

</bundles_post_ra>
